<compile_context>
chip_gen: v7x
topology: tpu7x:2x2x1
jax: 0.10.0
libtpu: 0.0.40
codegen_flags: <defaults>
</compile_context>

<pallas_src>
import jax
import jax.numpy as jnp
from jax.experimental import pallas as pl
from jax.experimental.pallas import tpu as pltpu

N_EMBD = 320
N_HID = 4 * N_EMBD  # 1280
TK = 256            # reduction tile over N_HID (lane-aligned: 256 % 128 == 0)


def _time_embedding_kernel(t_ref, w1_ref, b1_ref, w2_ref, b2_ref, o_ref, acc_ref):
    # t:  (B, 320) f32      w1: (320, TK) bf16    b1: (1, TK)  f32
    # w2: (TK, 1280) bf16   b2: (1, 1280) f32     o:  (B, 1280) f32
    k = pl.program_id(0)

    @pl.when(k == 0)
    def _():
        # Seed the accumulator with linear_2's bias (added exactly once).
        acc_ref[...] = jnp.broadcast_to(b2_ref[...], acc_ref.shape)

    x = t_ref[...].astype(jnp.bfloat16)
    # linear_1 tile: (B, 320) @ (320, TK) -> f32 accum, f32 bias.
    h = jnp.dot(x, w1_ref[...], preferred_element_type=jnp.float32) + b1_ref[...]
    # SiLU in f32 (sigmoid lowers to EUP — free slot next to the MXU work).
    h = h * jax.nn.sigmoid(h)
    # linear_2 partial sum over this K-tile, accumulated in f32.
    acc_ref[...] += jnp.dot(h.astype(jnp.bfloat16), w2_ref[...],
                            preferred_element_type=jnp.float32)

    @pl.when(k == pl.num_programs(0) - 1)
    def _():
        o_ref[...] = acc_ref[...].astype(o_ref.dtype)


def time_embedding_pallas(time, w1, b1, w2, b2):
    """TimeEmbedding forward: linear_1 -> SiLU -> linear_2 in one streamed kernel."""
    B = time.shape[0]
    n_k = N_HID // TK
    flops = 2 * B * (N_EMBD * N_HID + N_HID * N_HID)
    bytes_accessed = (
        w1.size * w1.dtype.itemsize + w2.size * w2.dtype.itemsize
        + b1.size * b1.dtype.itemsize + b2.size * b2.dtype.itemsize
        + time.size * time.dtype.itemsize + B * N_HID * 4
    )
    return pl.pallas_call(
        _time_embedding_kernel,
        out_shape=jax.ShapeDtypeStruct((B, N_HID), jnp.float32),
        grid_spec=pltpu.PrefetchScalarGridSpec(
            num_scalar_prefetch=0,
            grid=(n_k,),
            in_specs=[
                pl.BlockSpec((B, N_EMBD), lambda k: (0, 0)),   # x (resident)
                pl.BlockSpec((N_EMBD, TK), lambda k: (0, k)),  # w1 column tile
                pl.BlockSpec((1, TK), lambda k: (0, k)),       # b1 tile
                pl.BlockSpec((TK, N_HID), lambda k: (k, 0)),   # w2 row tile
                pl.BlockSpec((1, N_HID), lambda k: (0, 0)),    # b2 (resident)
            ],
            out_specs=pl.BlockSpec((B, N_HID), lambda k: (0, 0)),
            scratch_shapes=[pltpu.VMEM((B, N_HID), jnp.float32)],
        ),
        compiler_params=pltpu.CompilerParams(
            dimension_semantics=("arbitrary",),   # reduction over K-tiles
            vmem_limit_bytes=16 << 20,
        ),
        cost_estimate=pl.CostEstimate(
            flops=flops,
            transcendentals=B * N_HID,
            bytes_accessed=bytes_accessed,
        ),
    )(time, w1, b1, w2, b2)


def init_params(key):
    """Deterministic synthetic parameters for TimeEmbedding(320).

    Weights are stored (in, out) bf16 so the kernel computes x @ W + b
    (== PyTorch x @ W.T + b with W_torch = W.T); biases stay f32.
    """
    k1, k2, k3, k4 = jax.random.split(key, 4)
    s1 = 1.0 / jnp.sqrt(N_EMBD)
    s2 = 1.0 / jnp.sqrt(N_HID)
    w1 = jax.random.uniform(k1, (N_EMBD, N_HID), jnp.float32, -s1, s1).astype(jnp.bfloat16)
    b1 = jax.random.uniform(k2, (1, N_HID), jnp.float32, -s1, s1)
    w2 = jax.random.uniform(k3, (N_HID, N_HID), jnp.float32, -s2, s2).astype(jnp.bfloat16)
    b2 = jax.random.uniform(k4, (1, N_HID), jnp.float32, -s2, s2)
    return w1, b1, w2, b2


def diffusion_forward(latent, context, time, params):
    """Mirrors Diffusion.forward(latent, context, time)."""
    w1, b1, w2, b2 = params
    t_emb = time_embedding_pallas(time, w1, b1, w2, b2)
    # TODO(synk): UNET and UNET_OutputLayer definitions were not provided in the
    # module source; `output = self.final(self.unet(latent, context, t_emb))`
    # cannot be reproduced, so the time embedding (the only defined compute) is
    # returned.
    del latent, context
    return t_emb


def _reference_time_embedding_bf16(time, w1, b1, w2, b2):
    """Reference with the same bf16-weight / f32-accumulate recipe as the kernel."""
    h = jnp.dot(time.astype(jnp.bfloat16), w1, preferred_element_type=jnp.float32) + b1
    h = h * jax.nn.sigmoid(h)
    return jnp.dot(h.astype(jnp.bfloat16), w2, preferred_element_type=jnp.float32) + b2


def _reference_time_embedding_f32(time, w1, b1, w2, b2):
    """Full-f32 reference (loose sanity check for the bf16 weight path)."""
    h = time @ w1.astype(jnp.float32) + b1
    h = h * jax.nn.sigmoid(h)
    return h @ w2.astype(jnp.float32) + b2


if __name__ == "__main__":
    key = jax.random.PRNGKey(0)
    kp, kl, kc, kt = jax.random.split(key, 4)

    params = init_params(kp)

    B = 2
    latent = jax.random.normal(kl, (B, 4, 16, 16), jnp.float32)   # NCHW (unused, see TODO)
    context = jax.random.normal(kc, (B, 8, 32), jnp.float32)      # (B, seq, d) (unused, see TODO)
    time = jax.random.normal(kt, (B, N_EMBD), jnp.float32)        # (B, 320)

    out = diffusion_forward(latent, context, time, params)
    out = jax.block_until_ready(out)

    ref_bf16 = _reference_time_embedding_bf16(time, *params)
    ref_f32 = _reference_time_embedding_f32(time, *params)

    assert out.shape == (B, N_HID), out.shape
    # Tight check vs. a reference using the identical bf16/f32 recipe.
    assert jnp.allclose(out, ref_bf16, atol=2e-3, rtol=2e-3), \
        float(jnp.max(jnp.abs(out - ref_bf16)))
    # Loose sanity check vs. the pure f32 math (bf16 weight quantization error).
    assert jnp.allclose(out, ref_f32, atol=5e-2, rtol=5e-2), \
        float(jnp.max(jnp.abs(out - ref_f32)))

    print("KERNEL_OK")
</pallas_src>

<mosaic_0001>
module attributes {stable_mosaic.version = 11 : i64} {
  func.func @_time_embedding_kernel(%arg0: i32, %arg1: memref<2x320xf32, #tpu.memory_space<vmem>>, %arg2: memref<320x256xbf16, #tpu.memory_space<vmem>>, %arg3: memref<1x256xf32, #tpu.memory_space<vmem>>, %arg4: memref<256x1280xbf16, #tpu.memory_space<vmem>>, %arg5: memref<1x1280xf32, #tpu.memory_space<vmem>>, %arg6: memref<2x1280xf32, #tpu.memory_space<vmem>>, %arg7: memref<2x1280xf32, #tpu.memory_space<vmem>>) attributes {dimension_semantics = [#tpu.dimension_semantics<arbitrary>], iteration_bounds = array<i64: 5>, scalar_prefetch = 0 : i64, scratch_operands = 1 : i64, tpu.core_type = #tpu.core_type<tc>, window_params = [{pipeline_mode = #tpu.pipeline_mode<synchronous>, transform_indices = @transform_0, window_bounds = array<i64: 2, 320>}, {transform_indices = @transform_1, window_bounds = array<i64: 320, 256>}, {transform_indices = @transform_2, window_bounds = array<i64: 1, 256>}, {transform_indices = @transform_3, window_bounds = array<i64: 256, 1280>}, {pipeline_mode = #tpu.pipeline_mode<synchronous>, transform_indices = @transform_4, window_bounds = array<i64: 1, 1280>}, {pipeline_mode = #tpu.pipeline_mode<synchronous>, transform_indices = @transform_5, window_bounds = array<i64: 2, 1280>}]} {
    %c0_i32 = arith.constant 0 : i32
    %0 = arith.cmpi eq, %arg0, %c0_i32 : i32
    %1 = arith.extui %0 : i1 to i32
    %c0_i32_0 = arith.constant 0 : i32
    %2 = arith.cmpi ne, %1, %c0_i32_0 : i32
    scf.if %2 {
      %c0_15 = arith.constant 0 : index
      %c0_16 = arith.constant 0 : index
      %25 = vector.load %arg5[%c0_15, %c0_16] : memref<1x1280xf32, #tpu.memory_space<vmem>>, vector<1x1280xf32>
      %26 = vector.shape_cast %25 : vector<1x1280xf32> to vector<1x1280xf32>
      %27 = vector.broadcast %26 : vector<1x1280xf32> to vector<2x1280xf32>
      %c0_17 = arith.constant 0 : index
      %c0_18 = arith.constant 0 : index
      %28 = vector.load %arg7[%c0_17, %c0_18] : memref<2x1280xf32, #tpu.memory_space<vmem>>, vector<2x1280xf32>
      tpu.vector_store %arg7[%c0_17, %c0_18], %27 {strides = array<i32>} : memref<2x1280xf32, #tpu.memory_space<vmem>>, vector<2x1280xf32>,
    } else {
    }
    %c0 = arith.constant 0 : index
    %c0_1 = arith.constant 0 : index
    %3 = vector.load %arg1[%c0, %c0_1] : memref<2x320xf32, #tpu.memory_space<vmem>>, vector<2x320xf32>
    %4 = arith.truncf %3 : vector<2x320xf32> to vector<2x320xbf16>
    %c0_2 = arith.constant 0 : index
    %c0_3 = arith.constant 0 : index
    %5 = vector.load %arg2[%c0_2, %c0_3] : memref<320x256xbf16, #tpu.memory_space<vmem>>, vector<320x256xbf16>
    %cst = arith.constant dense<0.000000e+00> : vector<2x256xf32>
    %6 = tpu.matmul %4, %5, %cst {dimension_numbers = #tpu.dot_dimension_numbers<[1], [0], [0], [1], [0, 0, 1, 1], [], []>} : vector<2x320xbf16>, vector<320x256xbf16>, vector<2x256xf32> -> vector<2x256xf32>
    %c0_4 = arith.constant 0 : index
    %c0_5 = arith.constant 0 : index
    %7 = vector.load %arg3[%c0_4, %c0_5] : memref<1x256xf32, #tpu.memory_space<vmem>>, vector<1x256xf32>
    %8 = vector.broadcast %7 : vector<1x256xf32> to vector<2x256xf32>
    %9 = arith.addf %6, %8 : vector<2x256xf32>
    %10 = arith.negf %9 : vector<2x256xf32>
    %11 = math.exp %10 : vector<2x256xf32>
    %cst_6 = arith.constant 1.000000e+00 : f32
    %12 = vector.broadcast %cst_6 : f32 to vector<2x256xf32>
    %13 = arith.addf %12, %11 : vector<2x256xf32>
    %14 = arith.divf %12, %13 : vector<2x256xf32>
    %15 = arith.mulf %9, %14 : vector<2x256xf32>
    %c0_7 = arith.constant 0 : index
    %c0_8 = arith.constant 0 : index
    %16 = vector.load %arg7[%c0_7, %c0_8] : memref<2x1280xf32, #tpu.memory_space<vmem>>, vector<2x1280xf32>
    %17 = arith.truncf %15 : vector<2x256xf32> to vector<2x256xbf16>
    %c0_9 = arith.constant 0 : index
    %c0_10 = arith.constant 0 : index
    %18 = vector.load %arg4[%c0_9, %c0_10] : memref<256x1280xbf16, #tpu.memory_space<vmem>>, vector<256x1280xbf16>
    %cst_11 = arith.constant dense<0.000000e+00> : vector<2x1280xf32>
    %19 = tpu.matmul %17, %18, %cst_11 {dimension_numbers = #tpu.dot_dimension_numbers<[1], [0], [0], [1], [0, 0, 1, 1], [], []>} : vector<2x256xbf16>, vector<256x1280xbf16>, vector<2x1280xf32> -> vector<2x1280xf32>
    %20 = arith.addf %16, %19 : vector<2x1280xf32>
    %c0_12 = arith.constant 0 : index
    %c0_13 = arith.constant 0 : index
    %21 = vector.load %arg7[%c0_12, %c0_13] : memref<2x1280xf32, #tpu.memory_space<vmem>>, vector<2x1280xf32>
    tpu.vector_store %arg7[%c0_12, %c0_13], %20 {strides = array<i32>} : memref<2x1280xf32, #tpu.memory_space<vmem>>, vector<2x1280xf32>,
    %c4_i32 = arith.constant 4 : i32
    %22 = arith.cmpi eq, %arg0, %c4_i32 : i32
    %23 = arith.extui %22 : i1 to i32
    %c0_i32_14 = arith.constant 0 : i32
    %24 = arith.cmpi ne, %23, %c0_i32_14 : i32
    scf.if %24 {
      %c0_15 = arith.constant 0 : index
      %c0_16 = arith.constant 0 : index
      %25 = vector.load %arg7[%c0_15, %c0_16] : memref<2x1280xf32, #tpu.memory_space<vmem>>, vector<2x1280xf32>
      %c0_17 = arith.constant 0 : index
      %c0_18 = arith.constant 0 : index
      %26 = vector.load %arg6[%c0_17, %c0_18] : memref<2x1280xf32, #tpu.memory_space<vmem>>, vector<2x1280xf32>
      tpu.vector_store %arg6[%c0_17, %c0_18], %25 {strides = array<i32>} : memref<2x1280xf32, #tpu.memory_space<vmem>>, vector<2x1280xf32>,
    } else {
    }
    return
  }
  func.func @transform_0(%arg0: i32) -> (i32, i32) {
    %c0_i32 = arith.constant 0 : i32
    %c0_i32_0 = arith.constant 0 : i32
    %c0_i32_1 = arith.constant 0 : i32
    return %c0_i32, %c0_i32_0 : i32, i32
  }
  func.func @transform_1(%arg0: i32) -> (i32, i32) {
    %c0_i32 = arith.constant 0 : i32
    %c0_i32_0 = arith.constant 0 : i32
    return %c0_i32, %arg0 : i32, i32
  }
  func.func @transform_2(%arg0: i32) -> (i32, i32) {
    %c0_i32 = arith.constant 0 : i32
    %c0_i32_0 = arith.constant 0 : i32
    return %c0_i32, %arg0 : i32, i32
  }
  func.func @transform_3(%arg0: i32) -> (i32, i32) {
    %c0_i32 = arith.constant 0 : i32
    %c0_i32_0 = arith.constant 0 : i32
    return %arg0, %c0_i32 : i32, i32
  }
  func.func @transform_4(%arg0: i32) -> (i32, i32) {
    %c0_i32 = arith.constant 0 : i32
    %c0_i32_0 = arith.constant 0 : i32
    %c0_i32_1 = arith.constant 0 : i32
    return %c0_i32, %c0_i32_0 : i32, i32
  }
  func.func @transform_5(%arg0: i32) -> (i32, i32) {
    %c0_i32 = arith.constant 0 : i32
    %c0_i32_0 = arith.constant 0 : i32
    %c0_i32_1 = arith.constant 0 : i32
    return %c0_i32, %c0_i32_0 : i32, i32
  }
}

</mosaic_0001>

<bundles_post_ra>
// kernel: tpu_custom_call.1
= control target key start
LH: loop header
LB: loop body
LE: loop exit
PB: predicated region body
PF: predicated region fallthrough
CT: control target
= control target key end

     0   :  { %s3585_s0 = inlined_call_operand.hbm [shape: f32[2,320], index: 0, kind: input, shape index: {}]   ;;  %s3586_s1 = inlined_call_operand.hbm [shape: bf16[320,1280], index: 1, kind: input, shape index: {}]   ;;  %s3587_s2 = inlined_call_operand.hbm [shape: f32[1,1280], index: 2, kind: input, shape index: {}]   ;;  %s3588_s3 = inlined_call_operand.hbm [shape: bf16[1280,1280], index: 3, kind: input, shape index: {}]   ;;  %s3589_s4 = inlined_call_operand.hbm [shape: f32[1,1280], index: 4, kind: input, shape index: {}]   ;;  %s3590_s5 = inlined_call_operand.hbm [shape: f32[2,1280], index: 5, kind: output, shape index: {}]  }
   0x1   :  { %3602 = sst [smem:[#allocation19_spill]] %s3586_s1 }
   0x2   :  { %3603 = sst [smem:[#allocation20_spill]] %s3589_s4 }
   0x3   :  { %10 = vsyncpa [#allocation4], 0 }
   0x4   :  { %11 = vsyncpa [#allocation7], 0 }
   0x5   :  { %13 = vsyncpa [#allocation7 + $0x1], 0 }
   0x6   :  { %14 = vsyncpa [#allocation10], 0 }
   0x7   :  { %16 = vsyncpa [#allocation10 + $0x1], 0 }
   0x8   :  { %17 = vsyncpa [#allocation5], 0  ;;  %s3070_s18 = smov 0   ;;  %s3072_s19 = smov 0  }
   0x9   :  { %s3074_s20 = smov 0   ;;  %s3076_s21 = smov 0  }
   0xa LB: > { %s3089_s22 = sadd.s32 4294967295, %s3025_s21   ;;  %s3092_s23 = sadd.s32 1, %s3025_s21   ;;  %s3025_s21 = sphi %s3076_s21, %s3631_s21   ;;  %s3021_s20 = sphi %s3074_s20, %s3630_s20   ;;  %s3017_s19 = sphi %s3072_s19, %s3629_s19   ;;  %s3013_s18 = sphi %s3070_s18, %s3628_s18  }
   0xb   : > { %s48_s24 = ssub.s32 %s3025_s21, %s3092_s23  ;;  %s51_s25 = sadd.s32 1, %s3021_s20 }
   0xc   : > { %p49_p0 = scmp.eq.s32.totalorder %s48_s24, 0  ;;  %p58_p1 = scmp.ne.s32.totalorder %s3021_s20, %s3017_s19 }
   0xd   : > { %p59_p2 = scmp.eq.s32.totalorder %s3025_s21, 0  ;;  %p64_p3 = scmp.ne.s32.totalorder %s3017_s19, %s3013_s18 }
   0xe   : > { %s3102_s26 = scalar_select %p49_p0, %s3021_s20, %s51_s25  }
   0xf   : > { %p3104_p4 = por %p59_p2, %p58_p1  ;;  %p3591_p5 = scmp.eq.s32.totalorder %s3089_s22, 0 }
  0x10   : > { %3604 = sst [smem:[#allocation18_spill]] %s3102_s26  ;;  %p2171_p6 = scmp.ge.s32.totalorder %s3025_s21, 1 }
  0x11   : > { %p169_p7 = scmp.lt.s32.totalorder %s3025_s21, 6  ;;  %p3113_p8 = por %p3591_p5, %p64_p3 }
  0x12   : > { %s3027_s30 = smov [#allocation11]   ;;  %p2447_p12 = scmp.lt.s32.totalorder %s3025_s21, 5 }
  0x13   : > { %s3606_s28 = scalar_select %p3113_p8, 1, 0 }
  0x14   : > { %p3118_p10 = pnand %p2171_p6, %p169_p7  ;;  %s193_s6 = sshll.u32 %s3027_s30, 4  ;;  %s194_s6 = int_to_ptr.vmem [resolvable:$true] %s193_s6 }
  0x15   : > { %s3598_s7 = sand.u32 1, %s3025_s21   ;;  %p3134_p0 = pnand %p2447_p12, %p3104_p4 }
  0x16   : > { %s3607_s29 = scalar_select %p3118_p10, 1, 0 }
  0x17   : > { %p2428_p11 = pneg %p3118_p10  ;;  %s3139_s10 = sand.u32 1, %s3021_s20  }
  0x18   : > { %s3609_s9 = scalar_select %p3134_p0, 1, 0 }
  0x19   : > { %p3128_p13 = pnand %p2428_p11, %p3591_p5  ;;  %s2405_s11 = smul.u32 320, %s3139_s10 }
  0x1a   : > { %s3610_s4 = sld [smem:[#allocation20_spill]] }
  0x1b   : > { %s3608_s8 = scalar_select %p3128_p13, 1, 0 }
  0x1c   : > { %p3595_p2 = pneg %p3128_p13 }
  0x20   : > { %s2803_s14 = scalar_lea.hbm %s3610_s4, 160 }
  0x21   : > { %p2804_p1 = scmp.ne.s32.totalorder %s3610_s4, %s2803_s14  ;;  %p2810_p6 = scmp.lt.u32.totalorder %s2803_s14, %s3610_s4 }
  0x23   : > { %p2806_p3 = pnand %p3595_p2, %p2804_p1 }
  0x25   : > { %p2807_p4 = pneg %p2806_p3 }
  0x27   : > { %p2812_p7 = pnand %p2810_p6, %p2807_p4 }
  0x29   : > { %2815 = shalt.err (!%p2812_p7)
}
  0x2a   : > { %s2816_s24 = scalar_lea.vmem %s194_s6, 160  ;;  %p2824_p5 = scmp.lt.s32.totalorder %s194_s6, %s194_s6 }
  0x2b   : > { %p2817_p11 = scmp.ne.s32.totalorder %s194_s6, %s2816_s24  ;;  %p2825_p8 = scmp.lt.s32.totalorder %s2816_s24, %s2816_s24 }
  0x2d   : > { %p2819_p12 = pnand %p2817_p11, %p3595_p2  ;;  %p2826_p10 = por %p2825_p8, %p2824_p5 }
  0x2f   : > { %p2820_p9 = pneg %p2819_p12 }
  0x31   : > { %p2827_p0 = pnand %p2826_p10, %p2820_p9 }
  0x33   : > { %2830 = shalt.err (!%p2827_p0)
}
  0x34   : > { %2434 = dma.hbm_to_vmem [thread:$0]  (!%p3128_p13), %s3610_s4, 160, %s194_s6, [#allocation10]  }
  0x35   : > { %s2397_s30 = sshll.u32 %s3025_s21, 7  ;;  %s208_s12 = scalar_lea.vmem [#allocation6], %s2405_s11 }
  0x36   : > { %s215_s13 = sshll.u32 %s208_s12, 4  ;;  %s3611_s1 = sld [smem:[#allocation19_spill]]  ;;  %s3170_s13 = int_to_ptr.vmem [resolvable:$true] %s215_s13 }
  0x37   : > { %s3174_s17 = scalar_lea.sflag [#allocation7], %s3598_s7  ;;  %p3612_p8 = scmp.ne.s32.totalorder %s3609_s9, 0 }
  0x39   : > { %p3180_p9 = pneg %p3612_p8 }
  0x3b   : > { %s3613_s6 = scalar_select %p3180_p9, 1, 0 }
  0x3c   : > { %s3168_s16 = scalar_lea.hbm %s3611_s1, %s2397_s30  ;;  %s2836_s25 = scalar_lea.hbm %s3611_s1, 25600 }
  0x3d   : > { %s2831_s18 = scalar_lea.hbm %s3168_s16, 5120  ;;  %p2837_p1 = scmp.lt.u32.totalorder %s3168_s16, %s3611_s1 }
  0x3e   : > { %p2832_p5 = scmp.ne.s32.totalorder %s3168_s16, %s2831_s18  ;;  %p2838_p3 = scmp.lt.u32.totalorder %s2836_s25, %s2831_s18 }
  0x3f   : > { %p2840_p6 = scmp.lt.u32.totalorder %s2831_s18, %s3168_s16 }
  0x40   : > { %p2834_p10 = pnand %p3180_p9, %p2832_p5  ;;  %p2839_p4 = por %p2838_p3, %p2837_p1 }
  0x42   : > { %p2835_p0 = pneg %p2834_p10  ;;  %p2841_p7 = por %p2840_p6, %p2839_p4 }
  0x44   : > { %p2842_p11 = pnand %p2841_p7, %p2835_p0 }
  0x46   : > { %2845 = shalt.err (!%p2842_p11)
}
  0x47   : > { %s2846_s12 = scalar_lea.vmem %s3170_s13, 5120  ;;  %s3028_s14 = smov [#allocation6]  }
  0x48   : > { %p2847_p12 = scmp.ne.s32.totalorder %s3170_s13, %s2846_s12  ;;  %s2851_s15 = sshll.u32 %s3028_s14, 4  ;;  %s2852_s15 = int_to_ptr.vmem [resolvable:$false] %s2851_s15 }
  0x49   : > { %s2853_s11 = scalar_lea.vmem %s2852_s15, 10240  ;;  %p2854_p2 = scmp.lt.s32.totalorder %s3170_s13, %s2852_s15 }
  0x4a   : > { %p2849_p5 = pnand %p2847_p12, %p3180_p9  ;;  %p2855_p13 = scmp.lt.s32.totalorder %s2853_s11, %s2846_s12 }
  0x4c   : > { %p2850_p10 = pneg %p2849_p5  ;;  %p2856_p1 = por %p2855_p13, %p2854_p2 }
  0x4e   : > { %p2857_p3 = pnand %p2856_p1, %p2850_p10 }
  0x50   : > { %2860 = shalt.err (!%p2857_p3)
}
  0x51   : > { %s3029_s18 = smov 640   ;;  %s3030_s24 = smov 128  }
  0x52   : > { %s3031_s25 = smov 8   ;;  %s3032_s27 = smov [#allocation3]  }
  0x53   : > { %2438 = dma.hbm_to_vmem [thread:$0]  (!%p3612_p8), %s3168_s16, 5120, %s3170_s13, %s3174_s17, %s3029_s18, %s3030_s24, %s3031_s25  }
  0x54   : > { %s182_s30 = sshll.u32 %s3032_s27, 4  ;;  %s2177_s14 = sshll.u32 %s3139_s10, 1  ;;  %s183_s30 = int_to_ptr.vmem [resolvable:$true] %s182_s30 }
  0x55   : > { %s2861_s11 = scalar_lea.hbm %s3585_s0, 96  ;;  %p3614_p2 = scmp.ne.s32.totalorder %s3608_s8, 0 }
  0x56   : > { %p2862_p13 = scmp.ne.s32.totalorder %s3585_s0, %s2861_s11  ;;  %p2868_p7 = scmp.lt.u32.totalorder %s2861_s11, %s3585_s0 }
  0x57   : > { %p3615_p0 = pneg %p3614_p2 }
  0x59   : > { %p2864_p4 = pnand %p2862_p13, %p3615_p0 }
  0x5b   : > { %p2865_p6 = pneg %p2864_p4 }
  0x5d   : > { %p2870_p11 = pnand %p2868_p7, %p2865_p6 }
  0x5f   : > { %2873 = shalt.err (!%p2870_p11)
}
  0x60   : > { %s2874_s13 = scalar_lea.vmem %s183_s30, 96  ;;  %p3616_p5 = pmov %p3615_p0 }
  0x61   : > { %p2875_p12 = scmp.ne.s32.totalorder %s183_s30, %s2874_s13  ;;  %p2882_p3 = scmp.lt.s32.totalorder %s183_s30, %s183_s30 }
  0x62   : > { %p2883_p8 = scmp.lt.s32.totalorder %s2874_s13, %s2874_s13 }
  0x63   : > { %p2877_p10 = pnand %p2875_p12, %p3616_p5 }
  0x64   : > { %p2884_p9 = por %p2883_p8, %p2882_p3 }
  0x65   : > { %p2878_p1 = pneg %p2877_p10 }
  0x67   : > { %p2885_p0 = pnand %p2884_p9, %p2878_p1 }
  0x69   : > { %2888 = shalt.err (!%p2885_p0)
}
  0x6a   : > { %2431 = dma.hbm_to_vmem [thread:$0]  (!%p3614_p2), %s3585_s0, 96, %s183_s30, [#allocation4]  }
  0x6b   : > { %s2398_s4 = sshll.u32 %s3025_s21, 5  ;;  %s229_s26 = scalar_lea.vmem [#allocation8], %s2177_s14 }
  0x6c   : > { %s237_s16 = sshll.u32 %s229_s26, 4  ;;  %s235_s27 = scalar_lea.hbm %s3587_s2, %s2398_s4  ;;  %s238_s16 = int_to_ptr.vmem [resolvable:$true] %s237_s16 }
  0x6d   : > { %s2889_s12 = scalar_lea.hbm %s235_s27, 32  ;;  %p3617_p9 = scmp.ne.s32.totalorder %s3613_s6, 0 }
  0x6e   : > { %p2890_p8 = scmp.ne.s32.totalorder %s235_s27, %s2889_s12  ;;  %s2894_s11 = scalar_lea.hbm %s3587_s2, 160 }
  0x6f   : > { %p2895_p2 = scmp.lt.u32.totalorder %s235_s27, %s3587_s2  ;;  %p2896_p6 = scmp.lt.u32.totalorder %s2894_s11, %s2889_s12 }
  0x70   : > { %p2892_p13 = pnand %p2890_p8, %p3617_p9  ;;  %p2898_p11 = scmp.lt.u32.totalorder %s2889_s12, %s235_s27 }
  0x71   : > { %p2897_p7 = por %p2896_p6, %p2895_p2 }
  0x72   : > { %p2893_p4 = pneg %p2892_p13 }
  0x73   : > { %p2899_p12 = por %p2898_p11, %p2897_p7 }
  0x75   : > { %p2900_p5 = pnand %p2899_p12, %p2893_p4 }
  0x77   : > { %2903 = shalt.err (!%p2900_p5)
}
  0x78   : > { %s2904_s30 = scalar_lea.vmem %s238_s16, 32  ;;  %s3033_s14 = smov [#allocation8]  }
  0x79   : > { %p2905_p10 = scmp.ne.s32.totalorder %s238_s16, %s2904_s30  ;;  %s2909_s7 = sshll.u32 %s3033_s14, 4  ;;  %s2910_s7 = int_to_ptr.vmem [resolvable:$false] %s2909_s7 }
  0x7a   : > { %s2911_s4 = scalar_lea.vmem %s2910_s7, 64  ;;  %p2912_p0 = scmp.lt.s32.totalorder %s238_s16, %s2910_s7 }
  0x7b   : > { %p2907_p1 = pnand %p2905_p10, %p3617_p9  ;;  %p2913_p8 = scmp.lt.s32.totalorder %s2911_s4, %s2904_s30 }
  0x7d   : > { %p2908_p3 = pneg %p2907_p1  ;;  %p2914_p13 = por %p2913_p8, %p2912_p0 }
  0x7f   : > { %p2915_p2 = pnand %p2914_p13, %p2908_p3 }
  0x81   : > { %2918 = shalt.err (!%p2915_p2)
}
  0x82   : > { %p3618_p6 = scmp.ne.s32.totalorder %s3609_s9, 0  ;;  %s2406_s26 = smul.u32 1280, %s3139_s10 }
  0x83   : > { %s2407_s24 = smul.u32 20480, %s3025_s21  ;;  %s3619_s13 = sand.u32 1, %s3025_s21  }
  0x84   : > { %2441 = dma.hbm_to_vmem [thread:$0]  (!%p3618_p6), %s235_s27, 32, %s238_s16, %s3174_s17  }
  0x85   : > { %s3248_s8 = scalar_lea.hbm %s3588_s3, %s2407_s24  ;;  %s248_s15 = scalar_lea.vmem [#allocation9], %s2406_s26 }
  0x86   : > { %s256_s11 = sshll.u32 %s248_s15, 4  ;;  %s3254_s1 = scalar_lea.sflag [#allocation10], %s3619_s13  ;;  %s3250_s11 = int_to_ptr.vmem [resolvable:$true] %s256_s11 }
  0x87   : > { %s2919_s30 = scalar_lea.hbm %s3248_s8, 20480  ;;  %s2924_s16 = scalar_lea.hbm %s3588_s3, 102400 }
  0x88   : > { %p2920_p4 = scmp.ne.s32.totalorder %s3248_s8, %s2919_s30  ;;  %p2925_p12 = scmp.lt.u32.totalorder %s3248_s8, %s3588_s3 }
  0x89   : > { %p2926_p5 = scmp.lt.u32.totalorder %s2924_s16, %s2919_s30  ;;  %p2928_p1 = scmp.lt.u32.totalorder %s2919_s30, %s3248_s8 }
  0x8a   : > { %p2922_p7 = pnand %p2920_p4, %p3617_p9 }
  0x8b   : > { %p2927_p10 = por %p2926_p5, %p2925_p12 }
  0x8c   : > { %p2923_p11 = pneg %p2922_p7 }
  0x8d   : > { %p2929_p3 = por %p2928_p1, %p2927_p10 }
  0x8f   : > { %p2930_p0 = pnand %p2929_p3, %p2923_p11 }
  0x91   : > { %2933 = shalt.err (!%p2930_p0)
}
  0x92   : > { %s2934_s21 = scalar_lea.vmem %s3250_s11, 20480  ;;  %s3034_s7 = smov [#allocation9]  }
  0x93   : > { %p2935_p8 = scmp.ne.s32.totalorder %s3250_s11, %s2934_s21  ;;  %s2939_s4 = sshll.u32 %s3034_s7, 4  ;;  %s2940_s4 = int_to_ptr.vmem [resolvable:$false] %s2939_s4 }
  0x94   : > { %s2941_s26 = scalar_lea.vmem %s2940_s4, 40960  ;;  %p2942_p4 = scmp.lt.s32.totalorder %s3250_s11, %s2940_s4 }
  0x95   : > { %p2937_p13 = pnand %p2935_p8, %p3617_p9  ;;  %p2943_p7 = scmp.lt.s32.totalorder %s2941_s26, %s2934_s21 }
  0x97   : > { %p2938_p2 = pneg %p2937_p13  ;;  %p2944_p12 = por %p2943_p7, %p2942_p4 }
  0x99   : > { %p2945_p5 = pnand %p2944_p12, %p2938_p2 }
  0x9b   : > { %2948 = shalt.err (!%p2945_p5)
}
  0x9c   : > { %s3035_s24 = smov 40   ;;  %p3620_p9 = scmp.ne.s32.totalorder %s3607_s29, 0 }
  0x9d   : > { %2444 = dma.hbm_to_vmem [thread:$0]  (!%p3618_p6), %s3248_s8, 20480, %s3250_s11, %s3254_s1, %s3029_s18, %s3029_s18, %s3035_s24  }
  0x9e   : > { %268 = sbr.rel (%p3620_p9) target bundleno = 907 (0x38b), region = 40  ;;  %p3621_p11 = scmp.eq.s32.totalorder (!%p3620_p9), %s3089_s22, 0 }
  0xa5   : > { %2992 = dma.done.wait (%p3621_p11), [#allocation4], 96   ;;  %p3622_p10 = pmov %p3621_p11 }
  0xa6   : > { %s274_s6 = sand.u32 1, %s3089_s22   ;;  %s276_s9 = sand.u32 1, %s3017_s19  }
  0xa7   : > { %2994 = vsyncadd (%p3622_p10), [#allocation4], 4294967200  ;;  %s2408_s25 = smul.u32 320, %s276_s9  ;;  %s275_s12 = scalar_lea.sflag [#allocation7], %s274_s6 }
  0xa8   : > { %p3623_p1 = scmp.ne.s32.totalorder %s3606_s28, 0 }
  0xa9   : > { %s3288_s15 = scalar_lea.vmem [#allocation6], %s2408_s25 }
  0xaa   : > { %2996 = dma.done.wait (%p3623_p1), %s275_s12, 5152  }
  0xab   : > { %2998 = vsyncadd (%p3623_p1), %s275_s12, 4294962144  ;;  %s2185_s29 = sshll.u32 %s276_s9, 1  ;;  %s2409_s18 = smul.u32 1280, %s276_s9 }
  0xac   : > { %s3294_s8 = scalar_lea.vmem [#allocation8], %s2185_s29  ;;  %s293_s11 = scalar_lea.sflag [#allocation10], %s274_s6 }
  0xad   : > { %s3296_s13 = scalar_lea.vmem [#allocation9], %s2409_s18 }
  0xae   : > { %3000 = dma.done.wait (%p3623_p1), %s293_s11, 20480  }
  0xaf   : > { %3002 = vsyncadd (%p3623_p1), %s293_s11, 4294946816  ;;  %p3624_p6 = pmov %p3622_p10 }
  0xb1   : > { %3004 = dma.done.wait (%p3624_p6), [#allocation10], 160   ;;  %p3625_p3 = pmov %p3624_p6 }
  0xb2   : > { %p3626_p0 = scmp.ne.s32.totalorder %s3089_s22, 0 }
  0xb3   : > { %3006 = vsyncadd (%p3625_p3), [#allocation10], 4294967136  ;;  %v344_v0 = vlaneseq (!%p3626_p0)  ;;  %v3036_v1 = vmov (!%p3626_p0), 1983009808   ;;  %v340_v4 = vld [vmem:[#allocation11] sm:$0xff] (!%p3626_p0) }
  0xb4   : > { %339 = sbr.rel (%p3626_p0) target bundleno = 197 (0xc5), region = 64  ;;  %v387_v2 = vunpack.c.l.s4 (!%p3626_p0), %v3036_v1  ;;  %v341_v14 = vld [vmem:[#allocation11 + $0x8] sm:$0x3] (!%p3626_p0) }
  0xb5   : > { %v345_v3 = vshrl.u32 (!%p3626_p0), %v344_v0, 7 }
  0xb6   : > { %v388_v5 = vunpack.c.0.s8 (!%p3626_p0), %v387_v2 }
  0xb7   : > { %v346_v6 = vsub.s32 (!%p3626_p0), 0, %v345_v3  ;;  %v350_v7 = vsub.s32 (!%p3626_p0), 1, %v345_v3  ;;  %v354_v8 = vsub.s32 (!%p3626_p0), 2, %v345_v3  ;;  %v358_v9 = vsub.s32 (!%p3626_p0), 3, %v345_v3 }
  0xb8   : > { %v391_v10 = vsub.s32 (!%p3626_p0), %v388_v5, %v345_v3  ;;  %v362_v11 = vsub.s32 (!%p3626_p0), 4, %v345_v3  ;;  %v366_v12 = vsub.s32 (!%p3626_p0), 5, %v345_v3  ;;  %v370_v13 = vsub.s32 (!%p3626_p0), 6, %v345_v3 }
  0xb9   : > { %v347_v15 = vrot.slane (!%p3626_p0), %v340_v4, %v346_v6  ;;  %v351_v16 = vrot.slane (!%p3626_p0), %v340_v4, %v350_v7  ;;  %v355_v17 = vrot.slane (!%p3626_p0), %v340_v4, %v354_v8  ;;  %v359_v18 = vrot.slane (!%p3626_p0), %v340_v4, %v358_v9 }
  0xba   : > { %v363_v19 = vrot.slane (!%p3626_p0), %v340_v4, %v362_v11  ;;  %v367_v20 = vrot.slane (!%p3626_p0), %v340_v4, %v366_v12  ;;  %v371_v21 = vrot.slane (!%p3626_p0), %v340_v4, %v370_v13  ;;  %v374_v22 = vsub.s32 (!%p3626_p0), 7, %v345_v3 }
  0xbb   : > { %v384_v23 = vcombine.low %v347_v15, %v351_v16  ;;  %v385_v24 = vcombine.low %v355_v17, %v359_v18  ;;  %v379_v25 = vrot.slane %v341_v14, %v346_v6  ;;  %v383_v26 = vrot.slane %v341_v14, %v350_v7 }
  0xbc   : > { %v375_v27 = vrot.slane %v340_v4, %v374_v22  ;;  %v401_v28 = vcombine.low %v363_v19, %v367_v20 }
  0xbd   : > { %v392_v29 = vrot.slane %v384_v23, %v391_v10  ;;  %v399_v30 = vrot.slane %v385_v24, %v391_v10  ;;  %v418_v31 = vcombine.low %v379_v25, %v383_v26 }
  0xbe   : > { %v402_v32 = vcombine.low %v371_v21, %v375_v27  ;;  %v409_v33 = vrot.slane %v401_v28, %v391_v10 }
  0xbf   : > { %v400_v34 = vcombine.low %v392_v29, %v399_v30  ;;  %2188 = vst.sshfl [vmem:[#allocation2 + $0x10] sm:$0x33 pattern:$0x76325410] %v418_v31 }
  0xc0   : > { %v416_v35 = vrot.slane %v402_v32, %v391_v10 }
  0xc1   : > { %429 = vst [vmem:[#allocation2] sm:$0xff] %v400_v34 }
  0xc2   : > { %v417_v36 = vcombine.low %v409_v33, %v416_v35 }
  0xc4   : > { %430 = vst [vmem:[#allocation2 + $0x8] sm:$0xff] %v417_v36 }
  0xc5 PF: > { %v2494_v37 = vld [vmem:[%s3288_s15 + $0x4] ss:$8 sps:$4 sm:$0xff]   ;;  %v2496_v38 = vld [vmem:[%s3288_s15] ss:$8 sps:$4 sm:$0xff]   ;;  %v2497_v39 = vld [vmem:[%s3288_s15 + $0x14] ss:$8 sps:$4 sm:$0xff]   ;;  %v438_v46 = vlaneseq }
  0xc6   : > { %712 = vmatprep.subr.bf16.mxu0 %v2494_v37  ;;  %v2499_v40 = vld [vmem:[%s3288_s15 + $0x10] ss:$8 sps:$4 sm:$0xff]   ;;  %v2500_v41 = vld [vmem:[%s3288_s15 + $0x24] ss:$8 sps:$4 sm:$0xff]   ;;  %v2502_v42 = vld [vmem:[%s3288_s15 + $0x20] ss:$8 sps:$4 sm:$0xff]  }
  0xc7   : > { %713 = vmatpush1.bf16.msra.mxu0 %v2496_v38  ;;  %v2503_v43 = vld [vmem:[%s3288_s15 + $0x34] ss:$8 sps:$4 sm:$0xff]   ;;  %v3037_v44 = vmov 1983009808   ;;  %v2505_v47 = vld [vmem:[%s3288_s15 + $0x30] ss:$8 sps:$4 sm:$0xff]  }
  0xc8   : > { %714 = vmatprep.subr.bf16.mxu0 %v2497_v39  ;;  %v436_v45 = vunpack.c.l.s4 %v3037_v44  ;;  %v2506_v48 = vld [vmem:[%s3288_s15 + $0x44] ss:$8 sps:$4 sm:$0xff]   ;;  %v3317_v50 = vshrl.u32 %v438_v46, 7  ;;  %v2508_v51 = vld [vmem:[%s3288_s15 + $0x40] ss:$8 sps:$4 sm:$0xff]   ;;  %v3038_v37 = vmov 0  }
  0xc9   : > { %v2509_v52 = vld [vmem:[%s3288_s15 + $0x54] ss:$8 sps:$4 sm:$0xff]   ;;  %v2511_v54 = vld [vmem:[%s3288_s15 + $0x50] ss:$8 sps:$4 sm:$0xff]   ;;  %v2512_v55 = vld [vmem:[%s3288_s15 + $0x64] ss:$8 sps:$4 sm:$0xff]  }
  0xca   : > { %v437_v49 = vunpack.c.0.s8 %v436_v45  ;;  %v3326_v56 = vld [vmem:[#allocation3] sm:$0x3f]  ;;  %v2514_v58 = vld [vmem:[%s3288_s15 + $0x60] ss:$8 sps:$4 sm:$0xff]   ;;  %v2518_v0 = vld [vmem:[%s3288_s15 + $0x84] ss:$8 sps:$4 sm:$0xff]  }
  0xcb   : > { %715 = vmatpush1.bf16.msra.mxu0 %v2499_v40  ;;  %v2515_v59 = vld [vmem:[%s3288_s15 + $0x74] ss:$8 sps:$4 sm:$0xff]   ;;  %v2517_v61 = vld [vmem:[%s3288_s15 + $0x70] ss:$8 sps:$4 sm:$0xff]   ;;  %v2560_v1 = vld [vmem:[%s3296_s13] ss:$40 sps:$4 sm:$0xff]   ;;  %v434_v39 = vcombine.high %v3326_v56, %v3326_v56 }
  0xcc   : > { %716 = vmatprep.subr.bf16.mxu0 %v2500_v41  ;;  %v3322_v53 = vsub.s32 %v437_v49, %v3317_v50  ;;  %v2555_v63 = vld [vmem:[%s3296_s13 + $0x4] ss:$40 sps:$4 sm:$0xff]   ;;  %v2561_v2 = vld [vmem:[%s3296_s13 + $0x54] ss:$40 sps:$4 sm:$0xff]   ;;  %v2521_v4 = vld [vmem:[%s3288_s15 + $0x94] ss:$8 sps:$4 sm:$0xff]  }
  0xcd   : > { %1773 = vmatprep.subr.bf16.mxu1 %v2555_v63  ;;  %v2520_v3 = vld [vmem:[%s3288_s15 + $0x80] ss:$8 sps:$4 sm:$0xff]   ;;  %v2566_v5 = vld [vmem:[%s3296_s13 + $0x50] ss:$40 sps:$4 sm:$0xff]   ;;  %v2523_v7 = vld [vmem:[%s3288_s15 + $0x90] ss:$8 sps:$4 sm:$0xff]  }
  0xce   : > { %v3330_v57 = vrot.slane %v3326_v56, %v3322_v53  ;;  %1774 = vmatpush1.bf16.msra.mxu1 %v2560_v1  ;;  %v2567_v6 = vld [vmem:[%s3296_s13 + $0xa4] ss:$40 sps:$4 sm:$0xff]   ;;  %v2524_v8 = vld [vmem:[%s3288_s15 + $0xa4] ss:$8 sps:$4 sm:$0xff]   ;;  %v2573_v10 = vld [vmem:[%s3296_s13 + $0xf4] ss:$40 sps:$4 sm:$0xff]  }
  0xcf   : > { %717 = vmatpush1.bf16.msra.mxu0 %v2502_v42  ;;  %1775 = vmatprep.subr.bf16.mxu1 %v2561_v2  ;;  %v2572_v9 = vld [vmem:[%s3296_s13 + $0xa0] ss:$40 sps:$4 sm:$0xff]   ;;  %v2526_v11 = vld [vmem:[%s3288_s15 + $0xa0] ss:$8 sps:$4 sm:$0xff]   ;;  %v2527_v12 = vld [vmem:[%s3288_s15 + $0xb4] ss:$8 sps:$4 sm:$0xff]   ;;  %v448_v42 = vrot.slane %v434_v39, %v3322_v53 }
  0xd0   : > { %718 = vmatprep.subr.bf16.mxu0 %v2503_v43  ;;  %v449_v60 = vcombine.high %v3330_v57, %v3330_v57  ;;  %v2578_v13 = vld [vmem:[%s3296_s13 + $0xf0] ss:$40 sps:$4 sm:$0xff]   ;;  %v2579_v14 = vld [vmem:[%s3296_s13 + $0x144] ss:$40 sps:$4 sm:$0xff]   ;;  %v2530_v16 = vld [vmem:[%s3288_s15 + $0xc4] ss:$8 sps:$4 sm:$0xff]   ;;  %v453_v33 = vpack.c.bf16 %v3330_v57, %v3330_v57 }
  0xd1   : > { %v2529_v15 = vld [vmem:[%s3288_s15 + $0xb0] ss:$8 sps:$4 sm:$0xff]   ;;  %v2584_v17 = vld [vmem:[%s3296_s13 + $0x140] ss:$40 sps:$4 sm:$0xff]   ;;  %v2532_v19 = vld [vmem:[%s3288_s15 + $0xc0] ss:$8 sps:$4 sm:$0xff]   ;;  %v455_v45 = vpack.c.bf16 %v448_v42, %v448_v42 }
  0xd2   : > { %v454_v62 = vpack.c.bf16 %v449_v60, %v449_v60  ;;  %1776 = vmatpush1.bf16.msra.mxu1 %v2566_v5  ;;  %v2585_v18 = vld [vmem:[%s3296_s13 + $0x194] ss:$40 sps:$4 sm:$0xff]   ;;  %v2590_v20 = vld [vmem:[%s3296_s13 + $0x190] ss:$40 sps:$4 sm:$0xff]   ;;  %v2591_v22 = vld [vmem:[%s3296_s13 + $0x1e4] ss:$40 sps:$4 sm:$0xff]  }
  0xd3   : > { %719 = vmatpush1.bf16.msra.mxu0 %v2505_v47  ;;  %1777 = vmatprep.subr.bf16.mxu1 %v2567_v6  ;;  %v2533_v21 = vld [vmem:[%s3288_s15 + $0xd4] ss:$8 sps:$4 sm:$0xff]   ;;  %v2535_v23 = vld [vmem:[%s3288_s15 + $0xd0] ss:$8 sps:$4 sm:$0xff]   ;;  %v2596_v24 = vld [vmem:[%s3296_s13 + $0x1e0] ss:$40 sps:$4 sm:$0xff]  }
  0xd4   : > { %720 = vmatprep.subr.bf16.mxu0 %v2506_v48  ;;  %744 = vmatprep.mubr.bf16.mxu0 %v454_v62  ;;  %v2536_v25 = vld [vmem:[%s3288_s15 + $0xe4] ss:$8 sps:$4 sm:$0xff]   ;;  %v2597_v26 = vld [vmem:[%s3296_s13 + $0x234] ss:$40 sps:$4 sm:$0xff]   ;;  %v2602_v28 = vld [vmem:[%s3296_s13 + $0x230] ss:$40 sps:$4 sm:$0xff]  }
  0xd5   : > { %v2538_v27 = vld [vmem:[%s3288_s15 + $0xe0] ss:$8 sps:$4 sm:$0xff]   ;;  %v2539_v29 = vld [vmem:[%s3288_s15 + $0xf4] ss:$8 sps:$4 sm:$0xff]   ;;  %v2541_v30 = vld [vmem:[%s3288_s15 + $0xf0] ss:$8 sps:$4 sm:$0xff]  }
  0xd6   : > { %1778 = vmatpush1.bf16.msra.mxu1 %v2572_v9  ;;  %v2545_v31 = vld [vmem:[%s3288_s15 + $0x104] ss:$8 sps:$4 sm:$0xff]   ;;  %v2543_v32 = vld [vmem:[%s3288_s15 + $0x100] ss:$8 sps:$4 sm:$0xff]   ;;  %v2548_v34 = vld [vmem:[%s3288_s15 + $0x114] ss:$8 sps:$4 sm:$0xff]  }
  0xd7   : > { %721 = vmatpush1.bf16.msra.mxu0 %v2508_v51  ;;  %1779 = vmatprep.subr.bf16.mxu1 %v2573_v10  ;;  %v2546_v35 = vld [vmem:[%s3288_s15 + $0x110] ss:$8 sps:$4 sm:$0xff]   ;;  %v2551_v36 = vld [vmem:[%s3288_s15 + $0x124] ss:$8 sps:$4 sm:$0xff]   ;;  %v2549_v38 = vld [vmem:[%s3288_s15 + $0x120] ss:$8 sps:$4 sm:$0xff]  }
  0xd8   : > { %722 = vmatprep.subr.bf16.mxu0 %v2509_v52  ;;  %v2554_v40 = vld [vmem:[%s3288_s15 + $0x134] ss:$8 sps:$4 sm:$0xff]   ;;  %v2552_v41 = vld [vmem:[%s3288_s15 + $0x130] ss:$8 sps:$4 sm:$0xff]   ;;  %vm708_vm0 = vcmask 523264   ;;  %p2392_p8 = scmp.ne.s32.totalorder %s3089_s22, 4 }
  0xd9   : > { %v2559_v43 = vld [vmem:[%s3296_s13 + $0x14] ss:$40 sps:$4 sm:$0xff]   ;;  %v2557_v44 = vld [vmem:[%s3296_s13 + $0x10] ss:$40 sps:$4 sm:$0xff]   ;;  %v2565_v46 = vld [vmem:[%s3296_s13 + $0x64] ss:$40 sps:$4 sm:$0xff]  }
  0xda   : > { %1780 = vmatpush1.bf16.msra.mxu1 %v2578_v13  ;;  %v2563_v47 = vld [vmem:[%s3296_s13 + $0x60] ss:$40 sps:$4 sm:$0xff]   ;;  %v2571_v48 = vld [vmem:[%s3296_s13 + $0xb4] ss:$40 sps:$4 sm:$0xff]   ;;  %v2569_v49 = vld [vmem:[%s3296_s13 + $0xb0] ss:$40 sps:$4 sm:$0xff]  }
  0xdb   : > { %723 = vmatpush1.bf16.msra.mxu0 %v2511_v54  ;;  %1781 = vmatprep.subr.bf16.mxu1 %v2579_v14  ;;  %v2577_v51 = vld [vmem:[%s3296_s13 + $0x104] ss:$40 sps:$4 sm:$0xff]   ;;  %v2575_v52 = vld [vmem:[%s3296_s13 + $0x100] ss:$40 sps:$4 sm:$0xff]   ;;  %v2583_v54 = vld [vmem:[%s3296_s13 + $0x154] ss:$40 sps:$4 sm:$0xff]  }
  0xdc   : > { %724 = vmatprep.subr.bf16.mxu0 %v2512_v55  ;;  %v2581_v55 = vld [vmem:[%s3296_s13 + $0x150] ss:$40 sps:$4 sm:$0xff]   ;;  %v2589_v56 = vld [vmem:[%s3296_s13 + $0x1a4] ss:$40 sps:$4 sm:$0xff]   ;;  %v2587_v57 = vld [vmem:[%s3296_s13 + $0x1a0] ss:$40 sps:$4 sm:$0xff]  }
  0xdd   : > { %v2601_v60 = vld [vmem:[%s3296_s13 + $0x244] ss:$40 sps:$4 sm:$0xff]   ;;  %v2607_v63 = vld [vmem:[%s3296_s13 + $0x294] ss:$40 sps:$4 sm:$0xff]   ;;  %v2608_v1 = vld [vmem:[%s3296_s13 + $0x280] ss:$40 sps:$4 sm:$0xff]  }
  0xde   : > { %1782 = vmatpush1.bf16.msra.mxu1 %v2584_v17  ;;  %v2603_v62 = vld [vmem:[%s3296_s13 + $0x284] ss:$40 sps:$4 sm:$0xff]   ;;  %v2609_v2 = vld [vmem:[%s3296_s13 + $0x2d4] ss:$40 sps:$4 sm:$0xff]   ;;  %v2614_v5 = vld [vmem:[%s3296_s13 + $0x2d0] ss:$40 sps:$4 sm:$0xff]  }
  0xdf   : > { %725 = vmatpush1.bf16.msra.mxu0 %v2514_v58  ;;  %1783 = vmatprep.subr.bf16.mxu1 %v2585_v18  ;;  %v2595_v58 = vld [vmem:[%s3296_s13 + $0x1f4] ss:$40 sps:$4 sm:$0xff]   ;;  %v2615_v6 = vld [vmem:[%s3296_s13 + $0x324] ss:$40 sps:$4 sm:$0xff]   ;;  %v2620_v9 = vld [vmem:[%s3296_s13 + $0x320] ss:$40 sps:$4 sm:$0xff]  }
  0xe0   : > { %726 = vmatprep.subr.bf16.mxu0 %v2515_v59  ;;  %v2593_v59 = vld [vmem:[%s3296_s13 + $0x1f0] ss:$40 sps:$4 sm:$0xff]   ;;  %v2621_v10 = vld [vmem:[%s3296_s13 + $0x374] ss:$40 sps:$4 sm:$0xff]   ;;  %v2627_v14 = vld [vmem:[%s3296_s13 + $0x3c4] ss:$40 sps:$4 sm:$0xff]  }
  0xe1   : > { %v2626_v13 = vld [vmem:[%s3296_s13 + $0x370] ss:$40 sps:$4 sm:$0xff]   ;;  %v2632_v17 = vld [vmem:[%s3296_s13 + $0x3c0] ss:$40 sps:$4 sm:$0xff]   ;;  %v2633_v18 = vld [vmem:[%s3296_s13 + $0x414] ss:$40 sps:$4 sm:$0xff]  }
  0xe2   : > { %1784 = vmatpush1.bf16.msra.mxu1 %v2590_v20  ;;  %v2635_v20 = vld [vmem:[%s3296_s13 + $0x420] ss:$40 sps:$4 sm:$0xff]  }
  0xe3   : > { %727 = vmatpush1.bf16.msra.mxu0 %v2517_v61  ;;  %1785 = vmatprep.subr.bf16.mxu1 %v2591_v22  ;;  %v2599_v61 = vld [vmem:[%s3296_s13 + $0x240] ss:$40 sps:$4 sm:$0xff]   ;;  %v2639_v22 = vld [vmem:[%s3296_s13 + $0x464] ss:$40 sps:$4 sm:$0xff]  }
  0xe4   : > { %728 = vmatprep.subr.bf16.mxu0 %v2518_v0  ;;  %v2605_v0 = vld [vmem:[%s3296_s13 + $0x290] ss:$40 sps:$4 sm:$0xff]  }
  0xe6   : > { %1786 = vmatpush1.bf16.msra.mxu1 %v2596_v24  ;;  %v2641_v24 = vld [vmem:[%s3296_s13 + $0x470] ss:$40 sps:$4 sm:$0xff]  }
  0xe7   : > { %729 = vmatpush1.bf16.msra.mxu0 %v2520_v3  ;;  %1787 = vmatprep.subr.bf16.mxu1 %v2597_v26  ;;  %v2613_v3 = vld [vmem:[%s3296_s13 + $0x2e4] ss:$40 sps:$4 sm:$0xff]   ;;  %v2645_v26 = vld [vmem:[%s3296_s13 + $0x4b4] ss:$40 sps:$4 sm:$0xff]  }
  0xe8   : > { %730 = vmatprep.subr.bf16.mxu0 %v2521_v4  ;;  %v2611_v4 = vld [vmem:[%s3296_s13 + $0x2e0] ss:$40 sps:$4 sm:$0xff]  }
  0xea   : > { %1788 = vmatpush1.bf16.msra.mxu1 %v2602_v28  ;;  %v2647_v28 = vld [vmem:[%s3296_s13 + $0x4c0] ss:$40 sps:$4 sm:$0xff]  }
  0xeb   : > { %731 = vmatpush1.bf16.msra.mxu0 %v2523_v7  ;;  %1789 = vmatprep.subr.bf16.mxu1 %v2603_v62  ;;  %v2619_v7 = vld [vmem:[%s3296_s13 + $0x334] ss:$40 sps:$4 sm:$0xff]  }
  0xec   : > { %732 = vmatprep.subr.bf16.mxu0 %v2524_v8  ;;  %v2617_v8 = vld [vmem:[%s3296_s13 + $0x330] ss:$40 sps:$4 sm:$0xff]   ;;  %v2665_v62 = vld [vmem:[%s3296_s13 + $0xac] ss:$40 sps:$4 sm:$0xff]  }
  0xee   : > { %1790 = vmatpush1.bf16.msra.mxu1 %v2608_v1  ;;  %v2666_v1 = vld [vmem:[%s3296_s13 + $0xc0] ss:$40 sps:$4 sm:$0xff]  }
  0xef   : > { %733 = vmatpush1.bf16.msra.mxu0 %v2526_v11  ;;  %1791 = vmatprep.subr.bf16.mxu1 %v2609_v2  ;;  %v2625_v11 = vld [vmem:[%s3296_s13 + $0x384] ss:$40 sps:$4 sm:$0xff]  }
  0xf0   : > { %734 = vmatprep.subr.bf16.mxu0 %v2527_v12  ;;  %v2623_v12 = vld [vmem:[%s3296_s13 + $0x380] ss:$40 sps:$4 sm:$0xff]   ;;  %v2671_v2 = vld [vmem:[%s3296_s13 + $0xfc] ss:$40 sps:$4 sm:$0xff]  }
  0xf2   : > { %1792 = vmatpush1.bf16.msra.mxu1 %v2614_v5  ;;  %v2672_v5 = vld [vmem:[%s3296_s13 + $0x110] ss:$40 sps:$4 sm:$0xff]  }
  0xf3   : > { %735 = vmatpush1.bf16.msra.mxu0 %v2529_v15  ;;  %1793 = vmatprep.subr.bf16.mxu1 %v2615_v6  ;;  %v2631_v15 = vld [vmem:[%s3296_s13 + $0x3d4] ss:$40 sps:$4 sm:$0xff]  }
  0xf4   : > { %736 = vmatprep.subr.bf16.mxu0 %v2530_v16  ;;  %v2629_v16 = vld [vmem:[%s3296_s13 + $0x3d0] ss:$40 sps:$4 sm:$0xff]   ;;  %v2677_v6 = vld [vmem:[%s3296_s13 + $0x14c] ss:$40 sps:$4 sm:$0xff]  }
  0xf6   : > { %1794 = vmatpush1.bf16.msra.mxu1 %v2620_v9  ;;  %v2678_v9 = vld [vmem:[%s3296_s13 + $0x160] ss:$40 sps:$4 sm:$0xff]  }
  0xf7   : > { %737 = vmatpush1.bf16.msra.mxu0 %v2532_v19  ;;  %1795 = vmatprep.subr.bf16.mxu1 %v2621_v10  ;;  %v2637_v19 = vld [vmem:[%s3296_s13 + $0x424] ss:$40 sps:$4 sm:$0xff]  }
  0xf8   : > { %738 = vmatprep.subr.bf16.mxu0 %v2533_v21  ;;  %v2638_v21 = vld [vmem:[%s3296_s13 + $0x410] ss:$40 sps:$4 sm:$0xff]   ;;  %v2683_v10 = vld [vmem:[%s3296_s13 + $0x19c] ss:$40 sps:$4 sm:$0xff]  }
  0xfa   : > { %1796 = vmatpush1.bf16.msra.mxu1 %v2626_v13  ;;  %v2684_v13 = vld [vmem:[%s3296_s13 + $0x1b0] ss:$40 sps:$4 sm:$0xff]  }
  0xfb   : > { %739 = vmatpush1.bf16.msra.mxu0 %v2535_v23  ;;  %1797 = vmatprep.subr.bf16.mxu1 %v2627_v14  ;;  %v2643_v23 = vld [vmem:[%s3296_s13 + $0x474] ss:$40 sps:$4 sm:$0xff]  }
  0xfc   : > { %740 = vmatprep.subr.bf16.mxu0 %v2536_v25  ;;  %v2644_v25 = vld [vmem:[%s3296_s13 + $0x460] ss:$40 sps:$4 sm:$0xff]   ;;  %v2689_v14 = vld [vmem:[%s3296_s13 + $0x1ec] ss:$40 sps:$4 sm:$0xff]  }
  0xfe   : > { %1798 = vmatpush1.bf16.msra.mxu1 %v2632_v17  ;;  %v2690_v17 = vld [vmem:[%s3296_s13 + $0x200] ss:$40 sps:$4 sm:$0xff]  }
  0xff   : > { %741 = vmatpush1.bf16.msra.mxu0 %v2538_v27  ;;  %1799 = vmatprep.subr.bf16.mxu1 %v2633_v18  ;;  %v2649_v27 = vld [vmem:[%s3296_s13 + $0x4c4] ss:$40 sps:$4 sm:$0xff]  }
 0x100   : > { %742 = vmatprep.subr.bf16.mxu0 %v2539_v29  ;;  %v2650_v29 = vld [vmem:[%s3296_s13 + $0x4b0] ss:$40 sps:$4 sm:$0xff]   ;;  %v2695_v18 = vld [vmem:[%s3296_s13 + $0x23c] ss:$40 sps:$4 sm:$0xff]  }
 0x102   : > { %1800 = vmatpush1.bf16.msra.mxu1 %v2638_v21  ;;  %v2696_v21 = vld [vmem:[%s3296_s13 + $0x250] ss:$40 sps:$4 sm:$0xff]  }
 0x103   : > { %743 = vmatpush1.bf16.msra.mxu0 %v2541_v30  ;;  %1801 = vmatprep.subr.bf16.mxu1 %v2639_v22  ;;  %v2653_v30 = vld [vmem:[%s3296_s13 + $0xc] ss:$40 sps:$4 sm:$0xff]  }
 0x104   : > { %753 = vmatprep.subr.bf16.mxu0 %v2545_v31  ;;  %v2656_v31 = vld [vmem:[%s3296_s13 + $0x24] ss:$40 sps:$4 sm:$0xff]  }
 0x105   : > { %v2701_v22 = vld [vmem:[%s3296_s13 + $0x28c] ss:$40 sps:$4 sm:$0xff]  }
 0x106   : > { %745 = vmatmul.mubr.bf16.vlgmr.msra.gmra.mrb[0].mxu0 %v453_v33  ;;  %1802 = vmatpush1.bf16.msra.mxu1 %v2644_v25  ;;  %v496_v33 = vld [vmem:[%s3294_s8] sm:$0x3]  ;;  %v2702_v25 = vld [vmem:[%s3296_s13 + $0x2a0] ss:$40 sps:$4 sm:$0xff]  }
 0x107   : > { %754 = vmatpush1.bf16.msra.mxu0 %v2543_v32  ;;  %785 = vmatprep.mubr.bf16.mxu0 %v3038_v37  ;;  %v500_v32 = vsub.s32 0, %v3317_v50 }
 0x108   : > { %755 = vmatprep.subr.bf16.mxu0 %v2548_v34  ;;  %1803 = vmatprep.subr.bf16.mxu1 %v2645_v26  ;;  %v504_v34 = vsub.s32 1, %v3317_v50  ;;  %v2707_v26 = vld [vmem:[%s3296_s13 + $0x2dc] ss:$40 sps:$4 sm:$0xff]  }
 0x10a   : > { %1804 = vmatpush1.bf16.msra.mxu1 %v2650_v29  ;;  %v2708_v29 = vld [vmem:[%s3296_s13 + $0x2f0] ss:$40 sps:$4 sm:$0xff]  }
 0x10b   : > { %756 = vmatpush1.bf16.msra.mxu0 %v2546_v35  ;;  %1814 = vmatprep.subr.bf16.mxu1 %v2653_v30  ;;  %v501_v35 = vrot.slane %v496_v33, %v500_v32  ;;  %v2713_v30 = vld [vmem:[%s3296_s13 + $0x32c] ss:$40 sps:$4 sm:$0xff]   ;;  %v2711_v32 = vld [vmem:[%s3296_s13 + $0x328] ss:$40 sps:$4 sm:$0xff]  }
 0x10c   : > { %757 = vmatprep.subr.bf16.mxu0 %v2551_v36  ;;  %v505_v36 = vrot.slane %v496_v33, %v504_v34  ;;  %v2714_v33 = vld [vmem:[%s3296_s13 + $0x340] ss:$40 sps:$4 sm:$0xff]   ;;  %v2719_v34 = vld [vmem:[%s3296_s13 + $0x37c] ss:$40 sps:$4 sm:$0xff]  }
 0x10f   : > { %758 = vmatpush1.bf16.msra.mxu0 %v2549_v38 }
 0x110   : > { %759 = vmatprep.subr.bf16.mxu0 %v2554_v40 }
 0x113   : > { %760 = vmatpush1.bf16.msra.mxu0 %v2552_v41 }
 0x114   : > { %1855 = vmatprep.subr.bf16.mxu0 %v2559_v43 }
 0x116   : > { %2229 = vmatmul.mubr.msk.bf16.vlgmr.msra.gmra.mrb[0].mxu0 %vm708_vm0, %v455_v45 }
 0x117   : > { %1856 = vmatpush1.bf16.msra.mxu0 %v2557_v44 }
 0x118   : > { %1857 = vmatprep.subr.bf16.mxu0 %v2565_v46 }
 0x11b   : > { %1858 = vmatpush1.bf16.msra.mxu0 %v2563_v47 }
 0x11c   : > { %1859 = vmatprep.subr.bf16.mxu0 %v2571_v48 }
 0x11f   : > { %1860 = vmatpush1.bf16.msra.mxu0 %v2569_v49 }
 0x120   : > { %1861 = vmatprep.subr.bf16.mxu0 %v2577_v51 }
 0x123   : > { %1862 = vmatpush1.bf16.msra.mxu0 %v2575_v52 }
 0x124   : > { %1863 = vmatprep.subr.bf16.mxu0 %v2583_v54 }
 0x127   : > { %1864 = vmatpush1.bf16.msra.mxu0 %v2581_v55  ;;  %v2651_v55 = vld [vmem:[%s3296_s13 + $0x8] ss:$40 sps:$4 sm:$0xff]  }
 0x128   : > { %1865 = vmatprep.subr.bf16.mxu0 %v2589_v56  ;;  %v2654_v56 = vld [vmem:[%s3296_s13 + $0x20] ss:$40 sps:$4 sm:$0xff]  }
 0x12b   : > { %1866 = vmatpush1.bf16.msra.mxu0 %v2587_v57 }
 0x12c   : > { %1867 = vmatprep.subr.bf16.mxu0 %v2595_v58  ;;  %v2659_v58 = vld [vmem:[%s3296_s13 + $0x5c] ss:$40 sps:$4 sm:$0xff]  }
 0x12f   : > { %1868 = vmatpush1.bf16.msra.mxu0 %v2593_v59  ;;  %v2662_v59 = vld [vmem:[%s3296_s13 + $0x74] ss:$40 sps:$4 sm:$0xff]  }
 0x130   : > { %1869 = vmatprep.subr.bf16.mxu0 %v2601_v60  ;;  %v2657_v60 = vld [vmem:[%s3296_s13 + $0x58] ss:$40 sps:$4 sm:$0xff]  }
 0x133   : > { %1870 = vmatpush1.bf16.msra.mxu0 %v2599_v61  ;;  %v2660_v61 = vld [vmem:[%s3296_s13 + $0x70] ss:$40 sps:$4 sm:$0xff]  }
 0x134   : > { %1871 = vmatprep.subr.bf16.mxu0 %v2607_v63  ;;  %v2668_v63 = vld [vmem:[%s3296_s13 + $0xc4] ss:$40 sps:$4 sm:$0xff]  }
 0x137   : > { %1872 = vmatpush1.bf16.msra.mxu0 %v2605_v0  ;;  %v2663_v0 = vld [vmem:[%s3296_s13 + $0xa8] ss:$40 sps:$4 sm:$0xff]  }
 0x138   : > { %1873 = vmatprep.subr.bf16.mxu0 %v2613_v3  ;;  %v2674_v3 = vld [vmem:[%s3296_s13 + $0x114] ss:$40 sps:$4 sm:$0xff]  }
 0x13b   : > { %1874 = vmatpush1.bf16.msra.mxu0 %v2611_v4  ;;  %v2669_v4 = vld [vmem:[%s3296_s13 + $0xf8] ss:$40 sps:$4 sm:$0xff]  }
 0x13c   : > { %1875 = vmatprep.subr.bf16.mxu0 %v2619_v7  ;;  %v2680_v7 = vld [vmem:[%s3296_s13 + $0x164] ss:$40 sps:$4 sm:$0xff]  }
 0x13f   : > { %1876 = vmatpush1.bf16.msra.mxu0 %v2617_v8  ;;  %v2675_v8 = vld [vmem:[%s3296_s13 + $0x148] ss:$40 sps:$4 sm:$0xff]  }
 0x140   : > { %1877 = vmatprep.subr.bf16.mxu0 %v2625_v11  ;;  %v2686_v11 = vld [vmem:[%s3296_s13 + $0x1b4] ss:$40 sps:$4 sm:$0xff]  }
 0x143   : > { %1878 = vmatpush1.bf16.msra.mxu0 %v2623_v12  ;;  %v2681_v12 = vld [vmem:[%s3296_s13 + $0x198] ss:$40 sps:$4 sm:$0xff]  }
 0x144   : > { %1879 = vmatprep.subr.bf16.mxu0 %v2631_v15  ;;  %v2692_v15 = vld [vmem:[%s3296_s13 + $0x204] ss:$40 sps:$4 sm:$0xff]  }
 0x147   : > { %1880 = vmatpush1.bf16.msra.mxu0 %v2629_v16  ;;  %v2687_v16 = vld [vmem:[%s3296_s13 + $0x1e8] ss:$40 sps:$4 sm:$0xff]  }
 0x148   : > { %1881 = vmatprep.subr.bf16.mxu0 %v2637_v19  ;;  %v2698_v19 = vld [vmem:[%s3296_s13 + $0x254] ss:$40 sps:$4 sm:$0xff]  }
 0x14b   : > { %1882 = vmatpush1.bf16.msra.mxu0 %v2635_v20  ;;  %v2693_v20 = vld [vmem:[%s3296_s13 + $0x238] ss:$40 sps:$4 sm:$0xff]  }
 0x14c   : > { %1883 = vmatprep.subr.bf16.mxu0 %v2643_v23  ;;  %v2704_v23 = vld [vmem:[%s3296_s13 + $0x2a4] ss:$40 sps:$4 sm:$0xff]  }
 0x14f   : > { %1884 = vmatpush1.bf16.msra.mxu0 %v2641_v24  ;;  %v2699_v24 = vld [vmem:[%s3296_s13 + $0x288] ss:$40 sps:$4 sm:$0xff]  }
 0x150   : > { %1885 = vmatprep.subr.bf16.mxu0 %v2649_v27  ;;  %v2710_v27 = vld [vmem:[%s3296_s13 + $0x2f4] ss:$40 sps:$4 sm:$0xff]  }
 0x153   : > { %1886 = vmatpush1.bf16.msra.mxu0 %v2647_v28  ;;  %v2705_v28 = vld [vmem:[%s3296_s13 + $0x2d8] ss:$40 sps:$4 sm:$0xff]  }
 0x154   : > { %1937 = vmatprep.subr.bf16.mxu0 %v2656_v31  ;;  %v2716_v31 = vld [vmem:[%s3296_s13 + $0x344] ss:$40 sps:$4 sm:$0xff]  }
 0x1e9   : > { %v787_v37 = vpop.f32.mrb[0].mxu0 }
 0x1ea   : > { %v2399_v38 = vadd.f32 %v787_v37, %v501_v35  ;;  %v789_v39 = vpop.f32.mrb[1].mxu0  ;;  %v2722_v35 = vld [vmem:[%s3296_s13 + $0x394] ss:$40 sps:$4 sm:$0xff]   ;;  %v2720_v37 = vld [vmem:[%s3296_s13 + $0x390] ss:$40 sps:$4 sm:$0xff]  }
 0x1eb   : > { %v2400_v40 = vadd.f32 %v789_v39, %v505_v36  ;;  %v791_v41 = vpop.f32.mrb[2].mxu0  ;;  %v2717_v36 = vld [vmem:[%s3296_s13 + $0x378] ss:$40 sps:$4 sm:$0xff]   ;;  %v2728_v39 = vld [vmem:[%s3296_s13 + $0x3e4] ss:$40 sps:$4 sm:$0xff]  }
 0x1ec   : > { %v2230_v42 = vmul.f32 -1.442695, %v2399_v38  ;;  %v792_v43 = vpop.f32.mrb[3].mxu0  ;;  %v2726_v41 = vld [vmem:[%s3296_s13 + $0x3e0] ss:$40 sps:$4 sm:$0xff]  }
 0x1ed   : > { %v2231_v44 = vmul.f32 -1.442695, %v2400_v40  ;;  %v2734_v43 = vld [vmem:[%s3296_s13 + $0x434] ss:$40 sps:$4 sm:$0xff]  }
 0x1ee   : > { %2795 = vpow2.f32 %v2230_v42  ;;  %v2731_v42 = vld [vmem:[%s3296_s13 + $0x41c] ss:$40 sps:$4 sm:$0xff]  }
 0x1ef   : > { %2797 = vpow2.f32 %v2231_v44  ;;  %v2729_v44 = vld [vmem:[%s3296_s13 + $0x418] ss:$40 sps:$4 sm:$0xff]  }
 0x1f8   : > { %v2796_v45 = vpop.eup %2795 }
 0x1f9   : > { %v2798_v46 = vpop.eup %2797  ;;  %v800_v47 = vadd.f32 1.0, %v2796_v45  ;;  %v2732_v45 = vld [vmem:[%s3296_s13 + $0x430] ss:$40 sps:$4 sm:$0xff]  }
 0x1fa   : > { %v801_v50 = vadd.f32 1.0, %v2798_v46  ;;  %v2737_v46 = vld [vmem:[%s3296_s13 + $0x46c] ss:$40 sps:$4 sm:$0xff]  }
 0x1fb   : > { %2799 = vrcp.f32 %v800_v47  ;;  %v2740_v47 = vld [vmem:[%s3296_s13 + $0x484] ss:$40 sps:$4 sm:$0xff]  }
 0x1fc   : > { %2801 = vrcp.f32 %v801_v50  ;;  %v2735_v50 = vld [vmem:[%s3296_s13 + $0x468] ss:$40 sps:$4 sm:$0xff]  }
 0x205   : > { %v2800_v48 = vpop.eup %2799 }
 0x206   : > { %v2802_v49 = vpop.eup %2801  ;;  %v806_v51 = vmul.f32 %v2800_v48, %v2399_v38  ;;  %v2725_v38 = vld [vmem:[%s3296_s13 + $0x3cc] ss:$40 sps:$4 sm:$0xff]   ;;  %v2738_v48 = vld [vmem:[%s3296_s13 + $0x480] ss:$40 sps:$4 sm:$0xff]  }
 0x207   : > { %v807_v52 = vmul.f32 %v2802_v49, %v2400_v40  ;;  %v2723_v40 = vld [vmem:[%s3296_s13 + $0x3c8] ss:$40 sps:$4 sm:$0xff]   ;;  %v2743_v49 = vld [vmem:[%s3296_s13 + $0x4bc] ss:$40 sps:$4 sm:$0xff]  }
 0x208   : > { %v3439_v57 = vpack.c.bf16 %v806_v51, %v806_v51  ;;  %v2746_v51 = vld [vmem:[%s3296_s13 + $0x4d4] ss:$40 sps:$4 sm:$0xff]  }
 0x209   : > { %v3435_v54 = vpack.c.bf16 %v807_v52, %v807_v52  ;;  %v2741_v52 = vld [vmem:[%s3296_s13 + $0x4b8] ss:$40 sps:$4 sm:$0xff]  }
 0x20b   : > { %1805 = vmatprep.mubr.bf16.mxu1 %v3435_v54  ;;  %1887 = vmatprep.mubr.bf16.mxu0 %v3435_v54 }
 0x20c   : > { %1806 = vmatmul.mubr.bf16.vlgmr.msra.gmra.mrb[0].mxu1 %v3439_v57  ;;  %1888 = vmatmul.mubr.bf16.vlgmr.msra.gmra.mrb[4].mxu0 %v3439_v57 }
 0x20d   : > { %1815 = vmatpush1.bf16.msra.mxu1 %v2651_v55  ;;  %1938 = vmatpush1.bf16.msra.mxu0 %v2654_v56  ;;  %v2744_v55 = vld [vmem:[%s3296_s13 + $0x4d0] ss:$40 sps:$4 sm:$0xff]   ;;  %v2749_v56 = vld [vmem:[%s3296_s13 + $0x1c] ss:$40 sps:$4 sm:$0xff]  }
 0x20e   : > { %1846 = vmatprep.mubr.bf16.mxu1 %v3435_v54  ;;  %1969 = vmatprep.mubr.bf16.mxu0 %v3435_v54 }
 0x20f   : > { %1816 = vmatprep.subr.bf16.mxu1 %v2659_v58  ;;  %1939 = vmatprep.subr.bf16.mxu0 %v2662_v59  ;;  %v2747_v58 = vld [vmem:[%s3296_s13 + $0x18] ss:$40 sps:$4 sm:$0xff]   ;;  %v2752_v59 = vld [vmem:[%s3296_s13 + $0x6c] ss:$40 sps:$4 sm:$0xff]  }
 0x211   : > { %1817 = vmatpush1.bf16.msra.mxu1 %v2657_v60  ;;  %1940 = vmatpush1.bf16.msra.mxu0 %v2660_v61  ;;  %v2750_v60 = vld [vmem:[%s3296_s13 + $0x68] ss:$40 sps:$4 sm:$0xff]   ;;  %v2755_v61 = vld [vmem:[%s3296_s13 + $0xbc] ss:$40 sps:$4 sm:$0xff]  }
 0x212   : > { %1818 = vmatprep.subr.bf16.mxu1 %v2665_v62  ;;  %1941 = vmatprep.subr.bf16.mxu0 %v2668_v63  ;;  %v2753_v62 = vld [vmem:[%s3296_s13 + $0xb8] ss:$40 sps:$4 sm:$0xff]   ;;  %v2758_v63 = vld [vmem:[%s3296_s13 + $0x10c] ss:$40 sps:$4 sm:$0xff]  }
 0x215   : > { %1819 = vmatpush1.bf16.msra.mxu1 %v2663_v0  ;;  %1942 = vmatpush1.bf16.msra.mxu0 %v2666_v1  ;;  %v2756_v0 = vld [vmem:[%s3296_s13 + $0x108] ss:$40 sps:$4 sm:$0xff]   ;;  %v2761_v1 = vld [vmem:[%s3296_s13 + $0x15c] ss:$40 sps:$4 sm:$0xff]  }
 0x216   : > { %1820 = vmatprep.subr.bf16.mxu1 %v2671_v2  ;;  %1943 = vmatprep.subr.bf16.mxu0 %v2674_v3  ;;  %v2759_v2 = vld [vmem:[%s3296_s13 + $0x158] ss:$40 sps:$4 sm:$0xff]   ;;  %v2762_v3 = vld [vmem:[%s3296_s13 + $0x1a8] ss:$40 sps:$4 sm:$0xff]  }
 0x219   : > { %1821 = vmatpush1.bf16.msra.mxu1 %v2669_v4  ;;  %1944 = vmatpush1.bf16.msra.mxu0 %v2672_v5  ;;  %v2767_v4 = vld [vmem:[%s3296_s13 + $0x1fc] ss:$40 sps:$4 sm:$0xff]   ;;  %v2765_v5 = vld [vmem:[%s3296_s13 + $0x1f8] ss:$40 sps:$4 sm:$0xff]  }
 0x21a   : > { %1822 = vmatprep.subr.bf16.mxu1 %v2677_v6  ;;  %1945 = vmatprep.subr.bf16.mxu0 %v2680_v7  ;;  %v2770_v6 = vld [vmem:[%s3296_s13 + $0x24c] ss:$40 sps:$4 sm:$0xff]   ;;  %v2768_v7 = vld [vmem:[%s3296_s13 + $0x248] ss:$40 sps:$4 sm:$0xff]  }
 0x21d   : > { %1823 = vmatpush1.bf16.msra.mxu1 %v2675_v8  ;;  %1946 = vmatpush1.bf16.msra.mxu0 %v2678_v9  ;;  %v2773_v8 = vld [vmem:[%s3296_s13 + $0x29c] ss:$40 sps:$4 sm:$0xff]   ;;  %v2771_v9 = vld [vmem:[%s3296_s13 + $0x298] ss:$40 sps:$4 sm:$0xff]  }
 0x21e   : > { %1824 = vmatprep.subr.bf16.mxu1 %v2683_v10  ;;  %1947 = vmatprep.subr.bf16.mxu0 %v2686_v11  ;;  %v2776_v10 = vld [vmem:[%s3296_s13 + $0x2ec] ss:$40 sps:$4 sm:$0xff]   ;;  %v2774_v11 = vld [vmem:[%s3296_s13 + $0x2e8] ss:$40 sps:$4 sm:$0xff]  }
 0x221   : > { %1825 = vmatpush1.bf16.msra.mxu1 %v2681_v12  ;;  %1948 = vmatpush1.bf16.msra.mxu0 %v2684_v13  ;;  %v2779_v12 = vld [vmem:[%s3296_s13 + $0x33c] ss:$40 sps:$4 sm:$0xff]   ;;  %v2777_v13 = vld [vmem:[%s3296_s13 + $0x338] ss:$40 sps:$4 sm:$0xff]  }
 0x222   : > { %1826 = vmatprep.subr.bf16.mxu1 %v2689_v14  ;;  %1949 = vmatprep.subr.bf16.mxu0 %v2692_v15  ;;  %v2782_v14 = vld [vmem:[%s3296_s13 + $0x38c] ss:$40 sps:$4 sm:$0xff]   ;;  %v2780_v15 = vld [vmem:[%s3296_s13 + $0x388] ss:$40 sps:$4 sm:$0xff]  }
 0x225   : > { %1827 = vmatpush1.bf16.msra.mxu1 %v2687_v16  ;;  %1950 = vmatpush1.bf16.msra.mxu0 %v2690_v17  ;;  %v2785_v16 = vld [vmem:[%s3296_s13 + $0x3dc] ss:$40 sps:$4 sm:$0xff]   ;;  %v2783_v17 = vld [vmem:[%s3296_s13 + $0x3d8] ss:$40 sps:$4 sm:$0xff]  }
 0x226   : > { %1828 = vmatprep.subr.bf16.mxu1 %v2695_v18  ;;  %1951 = vmatprep.subr.bf16.mxu0 %v2698_v19  ;;  %v2788_v18 = vld [vmem:[%s3296_s13 + $0x42c] ss:$40 sps:$4 sm:$0xff]   ;;  %v2786_v19 = vld [vmem:[%s3296_s13 + $0x428] ss:$40 sps:$4 sm:$0xff]  }
 0x229   : > { %1829 = vmatpush1.bf16.msra.mxu1 %v2693_v20  ;;  %1952 = vmatpush1.bf16.msra.mxu0 %v2696_v21  ;;  %v2791_v20 = vld [vmem:[%s3296_s13 + $0x47c] ss:$40 sps:$4 sm:$0xff]   ;;  %v2789_v21 = vld [vmem:[%s3296_s13 + $0x478] ss:$40 sps:$4 sm:$0xff]  }
 0x22a   : > { %1830 = vmatprep.subr.bf16.mxu1 %v2701_v22  ;;  %1953 = vmatprep.subr.bf16.mxu0 %v2704_v23  ;;  %v2794_v22 = vld [vmem:[%s3296_s13 + $0x4cc] ss:$40 sps:$4 sm:$0xff]   ;;  %v2792_v23 = vld [vmem:[%s3296_s13 + $0x4c8] ss:$40 sps:$4 sm:$0xff]  }
 0x22d   : > { %1831 = vmatpush1.bf16.msra.mxu1 %v2699_v24  ;;  %1954 = vmatpush1.bf16.msra.mxu0 %v2702_v25 }
 0x22e   : > { %1832 = vmatprep.subr.bf16.mxu1 %v2707_v26  ;;  %1955 = vmatprep.subr.bf16.mxu0 %v2710_v27 }
 0x231   : > { %1833 = vmatpush1.bf16.msra.mxu1 %v2705_v28  ;;  %1956 = vmatpush1.bf16.msra.mxu0 %v2708_v29 }
 0x232   : > { %1834 = vmatprep.subr.bf16.mxu1 %v2713_v30  ;;  %1957 = vmatprep.subr.bf16.mxu0 %v2716_v31 }
 0x235   : > { %1835 = vmatpush1.bf16.msra.mxu1 %v2711_v32  ;;  %1958 = vmatpush1.bf16.msra.mxu0 %v2714_v33 }
 0x236   : > { %1836 = vmatprep.subr.bf16.mxu1 %v2719_v34  ;;  %1959 = vmatprep.subr.bf16.mxu0 %v2722_v35 }
 0x239   : > { %1837 = vmatpush1.bf16.msra.mxu1 %v2717_v36  ;;  %1960 = vmatpush1.bf16.msra.mxu0 %v2720_v37 }
 0x23a   : > { %1838 = vmatprep.subr.bf16.mxu1 %v2725_v38  ;;  %1961 = vmatprep.subr.bf16.mxu0 %v2728_v39 }
 0x23d   : > { %1839 = vmatpush1.bf16.msra.mxu1 %v2723_v40  ;;  %1962 = vmatpush1.bf16.msra.mxu0 %v2726_v41 }
 0x23e   : > { %1840 = vmatprep.subr.bf16.mxu1 %v2731_v42  ;;  %1963 = vmatprep.subr.bf16.mxu0 %v2734_v43  ;;  %v810_v42 = vld [vmem:[#allocation2 + $0x10] sm:$0xf] }
 0x241   : > { %1841 = vmatpush1.bf16.msra.mxu1 %v2729_v44  ;;  %1964 = vmatpush1.bf16.msra.mxu0 %v2732_v45 }
 0x242   : > { %1842 = vmatprep.subr.bf16.mxu1 %v2737_v46  ;;  %1965 = vmatprep.subr.bf16.mxu0 %v2740_v47  ;;  %v808_v47 = vld [vmem:[#allocation2] sm:$0xff] }
 0x245   : > { %1843 = vmatpush1.bf16.msra.mxu1 %v2735_v50  ;;  %1966 = vmatpush1.bf16.msra.mxu0 %v2738_v48 }
 0x246   : > { %1844 = vmatprep.subr.bf16.mxu1 %v2743_v49  ;;  %1967 = vmatprep.subr.bf16.mxu0 %v2746_v51 }
 0x249   : > { %1845 = vmatpush1.bf16.msra.mxu1 %v2741_v52  ;;  %1968 = vmatpush1.bf16.msra.mxu0 %v2744_v55 }
 0x24a   : > { %1896 = vmatprep.subr.bf16.mxu1 %v2749_v56 }
 0x24c   : > { %1847 = vmatmul.mubr.bf16.vlgmr.msra.gmra.mrb[4].mxu1 %v3439_v57  ;;  %1970 = vmatmul.mubr.bf16.vlgmr.msra.gmra.mrb[8].mxu0 %v3439_v57 }
 0x24d   : > { %1897 = vmatpush1.bf16.msra.mxu1 %v2747_v58  ;;  %1928 = vmatprep.mubr.bf16.mxu1 %v3435_v54  ;;  %v2764_v54 = vld [vmem:[%s3296_s13 + $0x1ac] ss:$40 sps:$4 sm:$0xff]  }
 0x24e   : > { %1898 = vmatprep.subr.bf16.mxu1 %v2752_v59 }
 0x251   : > { %1899 = vmatpush1.bf16.msra.mxu1 %v2750_v60 }
 0x252   : > { %1900 = vmatprep.subr.bf16.mxu1 %v2755_v61  ;;  %v809_v61 = vld [vmem:[#allocation2 + $0x8] sm:$0xff] }
 0x255   : > { %1901 = vmatpush1.bf16.msra.mxu1 %v2753_v62 }
 0x256   : > { %1902 = vmatprep.subr.bf16.mxu1 %v2758_v63 }
 0x259   : > { %1903 = vmatpush1.bf16.msra.mxu1 %v2756_v0 }
 0x25a   : > { %1904 = vmatprep.subr.bf16.mxu1 %v2761_v1 }
 0x25d   : > { %1905 = vmatpush1.bf16.msra.mxu1 %v2759_v2 }
 0x25e   : > { %1906 = vmatprep.subr.bf16.mxu1 %v2764_v54 }
 0x261   : > { %1907 = vmatpush1.bf16.msra.mxu1 %v2762_v3 }
 0x262   : > { %1908 = vmatprep.subr.bf16.mxu1 %v2767_v4 }
 0x265   : > { %1909 = vmatpush1.bf16.msra.mxu1 %v2765_v5 }
 0x266   : > { %1910 = vmatprep.subr.bf16.mxu1 %v2770_v6 }
 0x269   : > { %1911 = vmatpush1.bf16.msra.mxu1 %v2768_v7 }
 0x26a   : > { %1912 = vmatprep.subr.bf16.mxu1 %v2773_v8 }
 0x26d   : > { %1913 = vmatpush1.bf16.msra.mxu1 %v2771_v9 }
 0x26e   : > { %1914 = vmatprep.subr.bf16.mxu1 %v2776_v10 }
 0x271   : > { %1915 = vmatpush1.bf16.msra.mxu1 %v2774_v11 }
 0x272   : > { %1916 = vmatprep.subr.bf16.mxu1 %v2779_v12 }
 0x275   : > { %1917 = vmatpush1.bf16.msra.mxu1 %v2777_v13 }
 0x276   : > { %1918 = vmatprep.subr.bf16.mxu1 %v2782_v14 }
 0x279   : > { %1919 = vmatpush1.bf16.msra.mxu1 %v2780_v15 }
 0x27a   : > { %1920 = vmatprep.subr.bf16.mxu1 %v2785_v16 }
 0x27d   : > { %1921 = vmatpush1.bf16.msra.mxu1 %v2783_v17 }
 0x27e   : > { %1922 = vmatprep.subr.bf16.mxu1 %v2788_v18 }
 0x281   : > { %1923 = vmatpush1.bf16.msra.mxu1 %v2786_v19 }
 0x282   : > { %1924 = vmatprep.subr.bf16.mxu1 %v2791_v20 }
 0x285   : > { %1925 = vmatpush1.bf16.msra.mxu1 %v2789_v21 }
 0x286   : > { %1926 = vmatprep.subr.bf16.mxu1 %v2794_v22 }
 0x289   : > { %1927 = vmatpush1.bf16.msra.mxu1 %v2792_v23 }
 0x28c   : > { %1929 = vmatmul.mubr.bf16.vlgmr.msra.gmra.mrb[8].mxu1 %v3439_v57 }
 0x2df   : > { %v1807_v24 = vpop.f32.mrb[0].mxu1  ;;  %v1889_v25 = vpop.f32.mrb[4].mxu0 }
 0x2e0   : > { %v1809_v26 = vpop.f32.mrb[1].mxu1  ;;  %v1891_v27 = vpop.f32.mrb[5].mxu0 }
 0x2e1   : > { %v1988_v28 = vcombine.low %v1807_v24, %v1809_v26  ;;  %v2005_v29 = vcombine.low %v1889_v25, %v1891_v27  ;;  %v1811_v30 = vpop.f32.mrb[2].mxu1  ;;  %v1893_v31 = vpop.f32.mrb[6].mxu0 }
 0x2e2   : > { %v1812_v32 = vpop.f32.mrb[3].mxu1  ;;  %v1894_v33 = vpop.f32.mrb[7].mxu0 }
 0x2e3   : > { %v1996_v44 = vrot.slane %v1988_v28, %v3322_v53  ;;  %v2013_v59 = vrot.slane %v2005_v29, %v3322_v53 }
 0x31f   : > { %v1848_v34 = vpop.f32.mrb[4].mxu1  ;;  %v1971_v35 = vpop.f32.mrb[8].mxu0 }
 0x320   : > { %v1850_v36 = vpop.f32.mrb[5].mxu1  ;;  %v1973_v37 = vpop.f32.mrb[9].mxu0 }
 0x321   : > { %v1989_v38 = vcombine.low %v1848_v34, %v1850_v36  ;;  %v2022_v39 = vcombine.low %v1971_v35, %v1973_v37  ;;  %v1852_v40 = vpop.f32.mrb[6].mxu1  ;;  %v1975_v41 = vpop.f32.mrb[10].mxu0 }
 0x322   : > { %v1853_v57 = vpop.f32.mrb[7].mxu1  ;;  %v1976_v43 = vpop.f32.mrb[11].mxu0 }
 0x323   : > { %v2003_v45 = vrot.slane %v1989_v38, %v3322_v53  ;;  %v2029_v46 = vrot.slane %v2022_v39, %v3322_v53 }
 0x325   : > { %v2004_v50 = vcombine.low %v1996_v44, %v2003_v45  ;;  %v2035_v48 = vadd.f32 %v2029_v46, %v810_v42 }
 0x327   : > { %v2033_v49 = vadd.f32 %v2004_v50, %v808_v47  ;;  %2038 = vst [vmem:[#allocation2 + $0x10] sm:$0xf] %v2035_v48 }
 0x329   : > { %2036 = vst [vmem:[#allocation2] sm:$0xff] %v2033_v49 }
 0x32e   : > { %v2045_v2 = vld [vmem:[#allocation2 + $0x10] sm:$0xf] (!%p2392_p8) }
 0x32f   : > { %2048 = vst [vmem:[#allocation12 + $0x10] sm:$0xf] (!%p2392_p8), %v2045_v2 }
 0x330   : > { %v2043_v0 = vld [vmem:[#allocation2] sm:$0xff] (!%p2392_p8) }
 0x331   : > { %2046 = vst [vmem:[#allocation12] sm:$0xff] (!%p2392_p8), %v2043_v0 }
 0x35f   : > { %v1930_v51 = vpop.f32.mrb[8].mxu1 }
 0x360   : > { %v1932_v52 = vpop.f32.mrb[9].mxu1 }
 0x361   : > { %v2006_v55 = vcombine.low %v1930_v51, %v1932_v52  ;;  %v1934_v56 = vpop.f32.mrb[10].mxu1 }
 0x362   : > { %v1935_v58 = vpop.f32.mrb[11].mxu1 }
 0x363   : > { %v2020_v60 = vrot.slane %v2006_v55, %v3322_v53  ;;  %2042 = sbr.rel (%p2392_p8) target bundleno = 882 (0x372), region = 68 }
 0x365   : > { %v2021_v62 = vcombine.low %v2013_v59, %v2020_v60 }
 0x367   : > { %v2034_v63 = vadd.f32 %v2021_v62, %v809_v61 }
 0x369   : > { %2037 = vst [vmem:[#allocation2 + $0x8] sm:$0xff] %v2034_v63 }
 0x370   : > { %v2044_v1 = vld [vmem:[#allocation2 + $0x8] sm:$0xff] }
 0x371   : > { %2047 = vst [vmem:[#allocation12 + $0x8] sm:$0xff] %v2044_v1 }
 0x372 PF: > { %p2450_p13 = scmp.eq.s32.totalorder %s3089_s22, 4  ;;  %s3039_s28 = smov [#allocation12]  }
 0x373   : > { %s2056_s1 = sshll.u32 %s3039_s28, 4  ;;  %s2057_s1 = int_to_ptr.vmem [resolvable:$true] %s2056_s1 }
 0x374   : > { %s2949_s30 = scalar_lea.vmem %s2057_s1, 320  ;;  %p2956_p12 = scmp.lt.s32.totalorder %s2057_s1, %s2057_s1 }
 0x375   : > { %p2950_p2 = scmp.ne.s32.totalorder %s2057_s1, %s2949_s30  ;;  %p2957_p5 = scmp.lt.s32.totalorder %s2949_s30, %s2949_s30 }
 0x377   : > { %p2951_p4 = pnand %p2950_p2, %p2450_p13  ;;  %p2958_p9 = por %p2957_p5, %p2956_p12 }
 0x379   : > { %p2952_p7 = pneg %p2951_p4 }
 0x37b   : > { %p2959_p11 = pnand %p2958_p9, %p2952_p7 }
 0x37d   : > { %2962 = shalt.err (!%p2959_p11)
}
 0x37e   : > { %s2963_s16 = scalar_lea.hbm %s3590_s5, 320 }
 0x37f   : > { %p2964_p10 = scmp.ne.s32.totalorder %s3590_s5, %s2963_s16  ;;  %p2969_p3 = scmp.lt.u32.totalorder %s2963_s16, %s3590_s5 }
 0x381   : > { %p2965_p1 = pnand %p2964_p10, %p2450_p13 }
 0x383   : > { %p2966_p6 = pneg %p2965_p1 }
 0x385   : > { %p2971_p0 = pnand %p2969_p3, %p2966_p6 }
 0x387   : > { %2974 = shalt.err (!%p2971_p0)
}
 0x388   : > { %2425 = dma.vmem_to_hbm [thread:$0]  (%p2450_p13), %s2057_s1, 320, %s3590_s5, [#allocation5]  }
 0x389   : > { %3008 = dma.done.wait (%p2450_p13), [#allocation5], 320  }
 0x38a   : > { %3010 = vsyncadd (%p2450_p13), [#allocation5], 4294966976 }
 0x38b PF: > { %s3627_s24 = sld [smem:[#allocation18_spill]]  ;;  %p20_p8 = scmp.ge.s32.totalorder %s3092_s23, 7  }
 0x38c   : > { %s3628_s18 = smov %s3017_s19  ;;  %s3629_s19 = smov %s3021_s20 }
 0x38d   : > { %s3631_s21 = smov %s3092_s23  ;;  %22 = sbr.rel (!%p20_p8) target bundleno = 10 (0xa), region = 118 }
 0x391   : > { %s3630_s20 = smov %s3627_s24 }
 0x394   :  { %2069 = vsyncpa [#allocation4], 1 }
 0x395   :  { %2071 = vsyncpa [#allocation4 + $0x1], 1 }
 0x396   :  { %2072 = vsyncpa [#allocation7], 1 }
 0x397   :  { %2074 = vsyncpa [#allocation7 + $0x1], 1 }
 0x398   :  { %2075 = vsyncpa [#allocation10], 1 }
 0x399   :  { %2077 = vsyncpa [#allocation10 + $0x1], 1 }
 0x39a   :  { %2078 = vsyncpa [#allocation5], 1 }
 0x39b   :  { %2080 = vsyncpa [#allocation5 + $0x1], 1 }

</bundles_post_ra>
